<compile_context>
chip_gen: v7x
topology: tpu7x:2x2x1
jax: 0.10.0
libtpu: 0.0.40
codegen_flags: <defaults>
</compile_context>

<pallas_src>
import jax
import jax.numpy as jnp
from jax.experimental import pallas as pl
from jax.experimental.pallas import tpu as pltpu

LANE = 128               # TPU lane width (last-dim tiling unit)
DEFAULT_TILE_B = 4096    # batch rows per grid step (amortizes ~0.35us/step)


def _round_up(n, m):
    return ((n + m - 1) // m) * m


def _pad2(a, rows, cols):
    return jnp.pad(a, ((0, rows - a.shape[0]), (0, cols - a.shape[1])))


# ----------------------------------------------------------------------------
# Kernel: one batch tile of the full 3-layer MLP.
# ----------------------------------------------------------------------------
def qnet_kernel(x_ref, w1_ref, b1_ref, w2_ref, b2_ref, w3_ref, b3_ref, o_ref):
    # x arrives raw f32; cast to bf16 in VMEM (no extra HBM pass in the wrapper).
    x = x_ref[...].astype(jnp.bfloat16)
    # fc1 + relu   (bf16 MXU inputs, f32 accumulation)
    h1 = jnp.dot(x, w1_ref[...], preferred_element_type=jnp.float32)
    h1 = jnp.maximum(h1 + b1_ref[...], 0.0).astype(jnp.bfloat16)
    # fc2 + relu
    h2 = jnp.dot(h1, w2_ref[...], preferred_element_type=jnp.float32)
    h2 = jnp.maximum(h2 + b2_ref[...], 0.0).astype(jnp.bfloat16)
    # fc_out (no activation) -- output is written at the real action_dim width
    out = jnp.dot(h2, w3_ref[...], preferred_element_type=jnp.float32)
    o_ref[...] = (out + b3_ref[...]).astype(o_ref.dtype)


# ----------------------------------------------------------------------------
# Parameter prep: pad ONLY the hidden dim to the lane width, cast to bf16.
# Zero-padded weight rows/cols + zero bias pad keep the math exactly equal.
# ----------------------------------------------------------------------------
def prepare_params(params):
    s = params["w1"].shape[0]
    h = params["w1"].shape[1]
    a = params["w3"].shape[1]
    h_p = _round_up(h, LANE)

    return {
        "w1": _pad2(params["w1"], s, h_p).astype(jnp.bfloat16),     # (s,   h_p)
        "b1": _pad2(params["b1"], 1, h_p).astype(jnp.float32),      # (1,   h_p)
        "w2": _pad2(params["w2"], h_p, h_p).astype(jnp.bfloat16),   # (h_p, h_p)
        "b2": _pad2(params["b2"], 1, h_p).astype(jnp.float32),      # (1,   h_p)
        "w3": _pad2(params["w3"], h_p, a).astype(jnp.bfloat16),     # (h_p, a)
        "b3": params["b3"].astype(jnp.float32),                     # (1,   a)
        "dims": (s, h, a, h_p),
    }


def _choose_tile_b(B, tile_b):
    # Grow the tile with the batch (amortize per-step overhead), but keep it a
    # multiple of 8 and no larger than the (rounded) batch.
    tb = min(tile_b, _round_up(B, 8))
    # Ensure >= 2 grid steps when the batch allows it, so the "parallel" batch
    # axis feeds both v7x TensorCores (no-op on single-TC v5e/v6e).
    if B >= 32:
        tb = min(tb, _round_up(pl.cdiv(B, 2), 8))
    return max(tb, 8)


# ----------------------------------------------------------------------------
# Wrapper: batch-tiled grid (partial edge block, no batch padding),
# weights VMEM-resident, output directly at (B, action_dim).
# ----------------------------------------------------------------------------
def qnet_forward(x, prep, *, tile_b=DEFAULT_TILE_B):
    s, h, a, h_p = prep["dims"]
    B = x.shape[0]
    assert x.shape[1] == s

    tb = _choose_tile_b(B, tile_b)
    grid = (pl.cdiv(B, tb),)

    w1, b1, w2, b2, w3, b3 = (prep["w1"], prep["b1"], prep["w2"],
                              prep["b2"], prep["w3"], prep["b3"])

    weight_bytes = sum(int(t.size) * t.dtype.itemsize
                       for t in (w1, b1, w2, b2, w3, b3))
    # Constant-index-map blocks are still double-buffered by default; once the
    # weights are big (large hidden_dim) request a single buffer -- the blocks
    # never change -- so the footprint stays inside v7x's 64 MiB VMEM.
    single_buffer_weights = weight_bytes > (8 << 20)

    def resident(arr):
        idx = lambda i: (0,) * arr.ndim
        if single_buffer_weights:
            return pl.BlockSpec(arr.shape, idx, pipeline_mode=pl.Buffered(1))
        return pl.BlockSpec(arr.shape, idx)

    # Resident VMEM estimate: weights (x buffer count) + biases, double-buffered
    # x/out tiles, and f32/bf16 activation temporaries for h1/h2.
    wbuf = 1 if single_buffer_weights else 2
    est_bytes = (wbuf * weight_bytes
                 + 2 * tb * (s * 4 + a * 4)
                 + tb * h_p * 12)

    cp_kwargs = dict(dimension_semantics=("parallel",))
    if est_bytes > (12 << 20):     # headroom under v5e's 16 MiB default scoped VMEM
        try:
            phys = int(pltpu.get_tpu_info().vmem_capacity_bytes)
        except Exception:
            phys = 64 << 20        # conservative (v7x-sized) fallback
        cap = (phys * 7) // 8
        cp_kwargs["vmem_limit_bytes"] = max(min(int(est_bytes * 3 // 2), cap),
                                            12 << 20)

    return pl.pallas_call(
        qnet_kernel,
        out_shape=jax.ShapeDtypeStruct((B, a), jnp.float32),
        grid=grid,
        in_specs=[
            pl.BlockSpec((tb, s), lambda i: (i, 0)),   # x: batch-tiled, raw f32
            resident(w1), resident(b1),
            resident(w2), resident(b2),
            resident(w3), resident(b3),
        ],
        out_specs=pl.BlockSpec((tb, a), lambda i: (i, 0)),
        compiler_params=pltpu.CompilerParams(**cp_kwargs),
    )(x, w1, b1, w2, b2, w3, b3)


# ----------------------------------------------------------------------------
# Deterministic synthetic init (PyTorch-style uniform fan-in bounds), f32.
# ----------------------------------------------------------------------------
def init_params(key, state_dim, hidden_dim, action_dim):
    ks = jax.random.split(key, 6)

    def linear(kw, kb, fan_in, fan_out):
        bound = 1.0 / jnp.sqrt(jnp.float32(fan_in))
        # stored as [in, out] (transpose of torch's [out, in])
        w = jax.random.uniform(kw, (fan_in, fan_out), jnp.float32, -bound, bound)
        b = jax.random.uniform(kb, (1, fan_out), jnp.float32, -bound, bound)
        return w, b

    w1, b1 = linear(ks[0], ks[1], state_dim, hidden_dim)
    w2, b2 = linear(ks[2], ks[3], hidden_dim, hidden_dim)
    w3, b3 = linear(ks[4], ks[5], hidden_dim, action_dim)
    return {"w1": w1, "b1": b1, "w2": w2, "b2": b2, "w3": w3, "b3": b3}


def qnet_reference(x, p):
    h1 = jnp.maximum(x @ p["w1"] + p["b1"], 0.0)
    h2 = jnp.maximum(h1 @ p["w2"] + p["b2"], 0.0)
    return h2 @ p["w3"] + p["b3"]


if __name__ == "__main__":
    key = jax.random.PRNGKey(0)
    k_x, k_p = jax.random.split(key)

    batch, state_dim, hidden_dim, action_dim = 8, 4, 32, 2
    x = jax.random.normal(k_x, (batch, state_dim), jnp.float32)
    params = init_params(k_p, state_dim, hidden_dim, action_dim)
    prep = prepare_params(params)

    out = qnet_forward(x, prep)
    out = jax.block_until_ready(out)

    ref = qnet_reference(x, params)   # pure f32 reference
    assert out.shape == (batch, action_dim), out.shape
    # bf16 weights/activations with f32 accumulation -> loosened tolerance.
    assert jnp.allclose(out, ref, atol=5e-2, rtol=5e-2), (
        f"max abs diff {jnp.max(jnp.abs(out - ref))}")

    print("KERNEL_OK")
</pallas_src>

<mosaic_0001>
module attributes {stable_mosaic.version = 11 : i64} {
  func.func @qnet_kernel(%arg0: i32, %arg1: memref<8x4xf32, #tpu.memory_space<vmem>>, %arg2: memref<4x128xbf16, #tpu.memory_space<vmem>>, %arg3: memref<1x128xf32, #tpu.memory_space<vmem>>, %arg4: memref<128x128xbf16, #tpu.memory_space<vmem>>, %arg5: memref<1x128xf32, #tpu.memory_space<vmem>>, %arg6: memref<128x2xbf16, #tpu.memory_space<vmem>>, %arg7: memref<1x2xf32, #tpu.memory_space<vmem>>, %arg8: memref<8x2xf32, #tpu.memory_space<vmem>>) attributes {dimension_semantics = [#tpu.dimension_semantics<parallel>], iteration_bounds = array<i64: 1>, scalar_prefetch = 0 : i64, scratch_operands = 0 : i64, tpu.core_type = #tpu.core_type<tc>, window_params = [{transform_indices = @transform_0, window_bounds = array<i64: 8, 4>}, {pipeline_mode = #tpu.pipeline_mode<synchronous>, transform_indices = @transform_1, window_bounds = array<i64: 4, 128>}, {pipeline_mode = #tpu.pipeline_mode<synchronous>, transform_indices = @transform_2, window_bounds = array<i64: 1, 128>}, {pipeline_mode = #tpu.pipeline_mode<synchronous>, transform_indices = @transform_3, window_bounds = array<i64: 128, 128>}, {pipeline_mode = #tpu.pipeline_mode<synchronous>, transform_indices = @transform_4, window_bounds = array<i64: 1, 128>}, {pipeline_mode = #tpu.pipeline_mode<synchronous>, transform_indices = @transform_5, window_bounds = array<i64: 128, 2>}, {pipeline_mode = #tpu.pipeline_mode<synchronous>, transform_indices = @transform_6, window_bounds = array<i64: 1, 2>}, {transform_indices = @transform_7, window_bounds = array<i64: 8, 2>}]} {
    %c0 = arith.constant 0 : index
    %c0_0 = arith.constant 0 : index
    %0 = vector.load %arg1[%c0, %c0_0] : memref<8x4xf32, #tpu.memory_space<vmem>>, vector<8x4xf32>
    %1 = arith.truncf %0 : vector<8x4xf32> to vector<8x4xbf16>
    %c0_1 = arith.constant 0 : index
    %c0_2 = arith.constant 0 : index
    %2 = vector.load %arg2[%c0_1, %c0_2] : memref<4x128xbf16, #tpu.memory_space<vmem>>, vector<4x128xbf16>
    %cst = arith.constant dense<0.000000e+00> : vector<8x128xf32>
    %3 = tpu.matmul %1, %2, %cst {dimension_numbers = #tpu.dot_dimension_numbers<[1], [0], [0], [1], [0, 0, 1, 1], [], []>} : vector<8x4xbf16>, vector<4x128xbf16>, vector<8x128xf32> -> vector<8x128xf32>
    %c0_3 = arith.constant 0 : index
    %c0_4 = arith.constant 0 : index
    %4 = vector.load %arg3[%c0_3, %c0_4] : memref<1x128xf32, #tpu.memory_space<vmem>>, vector<1x128xf32>
    %5 = vector.broadcast %4 : vector<1x128xf32> to vector<8x128xf32>
    %6 = arith.addf %3, %5 : vector<8x128xf32>
    %cst_5 = arith.constant 0.000000e+00 : f32
    %7 = vector.broadcast %cst_5 : f32 to vector<8x128xf32>
    %8 = arith.maximumf %6, %7 : vector<8x128xf32>
    %9 = arith.truncf %8 : vector<8x128xf32> to vector<8x128xbf16>
    %c0_6 = arith.constant 0 : index
    %c0_7 = arith.constant 0 : index
    %10 = vector.load %arg4[%c0_6, %c0_7] : memref<128x128xbf16, #tpu.memory_space<vmem>>, vector<128x128xbf16>
    %cst_8 = arith.constant dense<0.000000e+00> : vector<8x128xf32>
    %11 = tpu.matmul %9, %10, %cst_8 {dimension_numbers = #tpu.dot_dimension_numbers<[1], [0], [0], [1], [0, 0, 1, 1], [], []>} : vector<8x128xbf16>, vector<128x128xbf16>, vector<8x128xf32> -> vector<8x128xf32>
    %c0_9 = arith.constant 0 : index
    %c0_10 = arith.constant 0 : index
    %12 = vector.load %arg5[%c0_9, %c0_10] : memref<1x128xf32, #tpu.memory_space<vmem>>, vector<1x128xf32>
    %13 = vector.broadcast %12 : vector<1x128xf32> to vector<8x128xf32>
    %14 = arith.addf %11, %13 : vector<8x128xf32>
    %cst_11 = arith.constant 0.000000e+00 : f32
    %15 = vector.broadcast %cst_11 : f32 to vector<8x128xf32>
    %16 = arith.maximumf %14, %15 : vector<8x128xf32>
    %17 = arith.truncf %16 : vector<8x128xf32> to vector<8x128xbf16>
    %c0_12 = arith.constant 0 : index
    %c0_13 = arith.constant 0 : index
    %18 = vector.load %arg6[%c0_12, %c0_13] : memref<128x2xbf16, #tpu.memory_space<vmem>>, vector<128x2xbf16>
    %cst_14 = arith.constant dense<0.000000e+00> : vector<8x2xf32>
    %19 = tpu.matmul %17, %18, %cst_14 {dimension_numbers = #tpu.dot_dimension_numbers<[1], [0], [0], [1], [0, 0, 1, 1], [], []>} : vector<8x128xbf16>, vector<128x2xbf16>, vector<8x2xf32> -> vector<8x2xf32>
    %c0_15 = arith.constant 0 : index
    %c0_16 = arith.constant 0 : index
    %20 = vector.load %arg7[%c0_15, %c0_16] : memref<1x2xf32, #tpu.memory_space<vmem>>, vector<1x2xf32>
    %21 = vector.broadcast %20 : vector<1x2xf32> to vector<8x2xf32>
    %22 = arith.addf %19, %21 : vector<8x2xf32>
    %c0_17 = arith.constant 0 : index
    %c0_18 = arith.constant 0 : index
    %23 = vector.load %arg8[%c0_17, %c0_18] : memref<8x2xf32, #tpu.memory_space<vmem>>, vector<8x2xf32>
    tpu.vector_store %arg8[%c0_17, %c0_18], %22 {strides = array<i32>} : memref<8x2xf32, #tpu.memory_space<vmem>>, vector<8x2xf32>,
    return
  }
  func.func @transform_0(%arg0: i32) -> (i32, i32) {
    %c0_i32 = arith.constant 0 : i32
    %c0_i32_0 = arith.constant 0 : i32
    return %arg0, %c0_i32 : i32, i32
  }
  func.func @transform_1(%arg0: i32) -> (i32, i32) {
    %c0_i32 = arith.constant 0 : i32
    %c0_i32_0 = arith.constant 0 : i32
    %c0_i32_1 = arith.constant 0 : i32
    return %c0_i32, %c0_i32_0 : i32, i32
  }
  func.func @transform_2(%arg0: i32) -> (i32, i32) {
    %c0_i32 = arith.constant 0 : i32
    %c0_i32_0 = arith.constant 0 : i32
    %c0_i32_1 = arith.constant 0 : i32
    return %c0_i32, %c0_i32_0 : i32, i32
  }
  func.func @transform_3(%arg0: i32) -> (i32, i32) {
    %c0_i32 = arith.constant 0 : i32
    %c0_i32_0 = arith.constant 0 : i32
    %c0_i32_1 = arith.constant 0 : i32
    return %c0_i32, %c0_i32_0 : i32, i32
  }
  func.func @transform_4(%arg0: i32) -> (i32, i32) {
    %c0_i32 = arith.constant 0 : i32
    %c0_i32_0 = arith.constant 0 : i32
    %c0_i32_1 = arith.constant 0 : i32
    return %c0_i32, %c0_i32_0 : i32, i32
  }
  func.func @transform_5(%arg0: i32) -> (i32, i32) {
    %c0_i32 = arith.constant 0 : i32
    %c0_i32_0 = arith.constant 0 : i32
    %c0_i32_1 = arith.constant 0 : i32
    return %c0_i32, %c0_i32_0 : i32, i32
  }
  func.func @transform_6(%arg0: i32) -> (i32, i32) {
    %c0_i32 = arith.constant 0 : i32
    %c0_i32_0 = arith.constant 0 : i32
    %c0_i32_1 = arith.constant 0 : i32
    return %c0_i32, %c0_i32_0 : i32, i32
  }
  func.func @transform_7(%arg0: i32) -> (i32, i32) {
    %c0_i32 = arith.constant 0 : i32
    %c0_i32_0 = arith.constant 0 : i32
    return %arg0, %c0_i32 : i32, i32
  }
}

</mosaic_0001>

<bundles_post_ra>
// kernel: tpu_custom_call.1
= control target key start
LH: loop header
LB: loop body
LE: loop exit
PB: predicated region body
PF: predicated region fallthrough
CT: control target
= control target key end

     0   :  { %vm41_vm0 = vcmask 1041408   ;;  %v421_v0 = vmov 0.0   ;;  %vm422_vm1 = vmmov 0   ;;  %vm37_vm2 = vcmask 31744   ;;  %s552_s1 = inlined_call_operand.vmem [shape: bf16[4,128], index: 1, kind: input, shape index: {}]   ;;  %s553_s0 = inlined_call_operand.vmem [shape: f32[8,4], index: 0, kind: input, shape index: {}]   ;;  %s554_s3 = inlined_call_operand.vmem [shape: bf16[128,128], index: 3, kind: input, shape index: {}]   ;;  %s555_s5 = inlined_call_operand.vmem [shape: bf16[128,2], index: 5, kind: input, shape index: {}]   ;;  %s556_s2 = inlined_call_operand.vmem [shape: f32[1,128], index: 2, kind: input, shape index: {}]   ;;  %s557_s4 = inlined_call_operand.vmem [shape: f32[1,128], index: 4, kind: input, shape index: {}]   ;;  %s558_s6 = inlined_call_operand.vmem [shape: f32[1,2], index: 6, kind: input, shape index: {}]   ;;  %s559_s7 = inlined_call_operand.vmem [shape: f32[8,2], index: 7, kind: output, shape index: {}]  }
   0x1   :  { %357 = vmatprep.subr.bf16.mxu0 %v421_v0  ;;  %v29_v1 = vld [vmem:[%s552_s1] sm:$0x3]  ;;  %359 = vmatprep.mubr.msk.bf16.mxu0 %vm422_vm1, %v421_v0  ;;  %v406_v6 = vld [vmem:[%s554_s3 + $0x8] sm:$0xff]   ;;  %v407_v7 = vld [vmem:[%s554_s3 + $0x10] sm:$0xff]   ;;  %vm311_vm3 = vcmask 15360  }
   0x2   :  { %v27_v2 = vld [vmem:[%s553_s0] sm:$0xff]  ;;  %v43_v3 = vsel %vm41_vm0, %v29_v1, 0  ;;  %363 = vmatprep.subr.bf16.mxu1 %v421_v0  ;;  %379 = vmatprep.mubr.msk.bf16.mxu1 %vm422_vm1, %v421_v0  ;;  %v408_v8 = vld [vmem:[%s554_s3 + $0x18] sm:$0xff]   ;;  %v410_v10 = vld [vmem:[%s554_s3 + $0x28] sm:$0xff]  }
   0x3   :  { %v28_v4 = vpack.c.bf16 %v27_v2, %v27_v2  ;;  %v405_v5 = vld [vmem:[%s554_s3] sm:$0xff]   ;;  %358 = vmatpush3.bf16.msra.mxu0 %v43_v3  ;;  %v411_v11 = vld [vmem:[%s554_s3 + $0x30] sm:$0xff]   ;;  %v412_v12 = vld [vmem:[%s554_s3 + $0x38] sm:$0xff]  }
   0x4   :  { %364 = vmatpush3.bf16.msra.mxu1 %v405_v5  ;;  %383 = vmatprep.subr.bf16.mxu0 %v421_v0  ;;  %v409_v9 = vld [vmem:[%s554_s3 + $0x20] sm:$0xff]   ;;  %v414_v14 = vld [vmem:[%s555_s5 + $0x8] sm:$0xff]   ;;  %v415_v15 = vld [vmem:[%s555_s5 + $0x10] sm:$0xff]  }
   0x5   :  { %365 = vmatprep.subr.bf16.mxu1 %v421_v0  ;;  %v413_v13 = vld [vmem:[%s555_s5] sm:$0xff]   ;;  %v416_v16 = vld [vmem:[%s555_s5 + $0x18] sm:$0xff]   ;;  %v418_v18 = vld [vmem:[%s555_s5 + $0x28] sm:$0xff]  }
   0x6   :  { %360 = vmatmul.mubr.msk.bf16.vlgmr.msra.gmra.mrb[0].mxu0 %vm37_vm2, %v28_v4  ;;  %v417_v17 = vld [vmem:[%s555_s5 + $0x20] sm:$0xff]   ;;  %v419_v27 = vld [vmem:[%s555_s5 + $0x30] sm:$0xff]   ;;  %v420_v28 = vld [vmem:[%s555_s5 + $0x38] sm:$0xff]  }
   0x7   :  { %399 = vmatprep.mubr.msk.bf16.mxu0 %vm422_vm1, %v421_v0  ;;  %384 = vmatpush3.bf16.msra.mxu0 %v413_v13  ;;  %v317_v19 = vld [vmem:[%s556_s2] ss:$0 sm:$0xff] }
   0x8   :  { %366 = vmatpush3.bf16.msra.mxu1 %v406_v6  ;;  %385 = vmatprep.subr.bf16.mxu0 %v421_v0  ;;  %v319_v29 = vld [vmem:[%s557_s4] ss:$0 sm:$0xff] }
   0x9   :  { %367 = vmatprep.subr.bf16.mxu1 %v421_v0  ;;  %v328_v37 = vld [vmem:[%s558_s6] ss:$0 sm:$0xff] }
   0xb   :  { %386 = vmatpush3.bf16.msra.mxu0 %v414_v14 }
   0xc   :  { %368 = vmatpush3.bf16.msra.mxu1 %v407_v7  ;;  %387 = vmatprep.subr.bf16.mxu0 %v421_v0 }
   0xd   :  { %369 = vmatprep.subr.bf16.mxu1 %v421_v0 }
   0xf   :  { %388 = vmatpush3.bf16.msra.mxu0 %v415_v15 }
  0x10   :  { %370 = vmatpush3.bf16.msra.mxu1 %v408_v8  ;;  %389 = vmatprep.subr.bf16.mxu0 %v421_v0 }
  0x11   :  { %371 = vmatprep.subr.bf16.mxu1 %v421_v0 }
  0x13   :  { %390 = vmatpush3.bf16.msra.mxu0 %v416_v16 }
  0x14   :  { %372 = vmatpush3.bf16.msra.mxu1 %v409_v9  ;;  %391 = vmatprep.subr.bf16.mxu0 %v421_v0 }
  0x15   :  { %373 = vmatprep.subr.bf16.mxu1 %v421_v0 }
  0x17   :  { %392 = vmatpush3.bf16.msra.mxu0 %v417_v17 }
  0x18   :  { %374 = vmatpush3.bf16.msra.mxu1 %v410_v10  ;;  %393 = vmatprep.subr.bf16.mxu0 %v421_v0 }
  0x19   :  { %375 = vmatprep.subr.bf16.mxu1 %v421_v0 }
  0x1b   :  { %394 = vmatpush3.bf16.msra.mxu0 %v418_v18 }
  0x1c   :  { %376 = vmatpush3.bf16.msra.mxu1 %v411_v11  ;;  %395 = vmatprep.subr.bf16.mxu0 %v421_v0 }
  0x1d   :  { %377 = vmatprep.subr.bf16.mxu1 %v421_v0 }
  0x1f   :  { %396 = vmatpush3.bf16.msra.mxu0 %v419_v27 }
  0x20   :  { %378 = vmatpush3.bf16.msra.mxu1 %v412_v12  ;;  %397 = vmatprep.subr.bf16.mxu0 %v421_v0 }
  0x23   :  { %398 = vmatpush3.bf16.msra.mxu0 %v420_v28 }
  0xd9   :  { %v79_v20 = vpop.f32.mrb[0].mxu0 }
  0xda   :  { %v80_v21 = vadd.f32 %v317_v19, %v79_v20  ;;  %v361_v22 = vpop.f32.mrb[1].mxu0 }
  0xdb   :  { %v82_v23 = vpop.f32.mrb[2].mxu0 }
  0xdc   :  { %v85_v24 = vmax.f32 %v80_v21, 0.0  ;;  %v362_v25 = vpop.f32.mrb[3].mxu0 }
  0xde   :  { %v86_v26 = vpack.c.bf16 %v85_v24, %v85_v24 }
  0xe0   :  { %380 = vmatmul.mubr.bf16.vlgmr.msra.gmra.mrb[0].mxu1 %v86_v26 }
 0x1b3   :  { %v192_v30 = vpop.f32.mrb[0].mxu1 }
 0x1b4   :  { %v193_v31 = vadd.f32 %v319_v29, %v192_v30  ;;  %v381_v32 = vpop.f32.mrb[1].mxu1 }
 0x1b5   :  { %v195_v33 = vpop.f32.mrb[2].mxu1 }
 0x1b6   :  { %v198_v34 = vmax.f32 %v193_v31, 0.0  ;;  %v382_v35 = vpop.f32.mrb[3].mxu1 }
 0x1b8   :  { %v199_v36 = vpack.c.bf16 %v198_v34, %v198_v34 }
 0x1ba   :  { %400 = vmatmul.mubr.bf16.vlgmr.msra.gmra.mrb[4].mxu0 %v199_v36 }
 0x28d   :  { %v305_v38 = vpop.f32.mrb[4].mxu0 }
 0x28e   :  { %v306_v39 = vadd.f32 %v328_v37, %v305_v38  ;;  %v401_v40 = vpop.f32.mrb[5].mxu0 }
 0x28f   :  { %v308_v41 = vpop.f32.mrb[6].mxu0 }
 0x290   :  { %312 = vst.msk [vmem:[%s559_s7] sm:$0xff] %vm311_vm3, %v306_v39  ;;  %v402_v42 = vpop.f32.mrb[7].mxu0 }

</bundles_post_ra>
